<compile_context>
chip_gen: v7x
topology: tpu7x:2x2x1
jax: 0.10.0
libtpu: 0.0.40
codegen_flags: <defaults>
</compile_context>

<pallas_src>
import jax
import jax.numpy as jnp
from jax.experimental import pallas as pl
from jax.experimental.pallas import tpu as pltpu


# ---------------------------------------------------------------------------
# Pallas kernel: elementwise trigger blend on lane-dense 2D tiles
# ---------------------------------------------------------------------------
def _trigger_blend_kernel(x_ref, inv_mask_ref, pat_masked_ref, o_ref):
    # x_ref:          (TB, F) tile of flattened images
    # inv_mask_ref:   (1,  F) VMEM-resident constant (1 - mask)
    # pat_masked_ref: (1,  F) VMEM-resident constant (pattern * mask)
    o_ref[...] = x_ref[...] * inv_mask_ref[...] + pat_masked_ref[...]


def _pick_block_rows(batch, row_bytes, target_bytes=4 << 20):
    """Rows-per-tile so each x/out tile is ~4 MiB, respecting the 8-sublane rule
    (tb % 8 == 0 unless tb == batch, in which case block dim == full dim is legal)."""
    tb = max(1, target_bytes // row_bytes)
    if tb >= batch:
        return batch                       # whole batch in one block (== full dim)
    tb = max(8, (tb // 8) * 8)             # sublane-aligned
    return min(tb, batch)


def trigger_badnet16(x, pattern, mask):
    """x: [B, C, H, W]; pattern/mask: [C, H, W]. Returns x*(1-mask)+pattern*mask."""
    B, C, H, W = x.shape
    assert pattern.shape == (C, H, W) and mask.shape == (C, H, W)
    F = C * H * W

    # Free metadata reshapes to a lane-dense 2D layout.
    x2 = x.reshape(B, F)
    inv_mask = (1.0 - mask).reshape(1, F).astype(x.dtype)
    pat_masked = (pattern * mask).reshape(1, F).astype(x.dtype)

    row_bytes = F * x.dtype.itemsize
    tb = _pick_block_rows(B, row_bytes)
    grid = (pl.cdiv(B, tb),)

    out2 = pl.pallas_call(
        _trigger_blend_kernel,
        out_shape=jax.ShapeDtypeStruct((B, F), x.dtype),
        grid_spec=pl.GridSpec(
            grid=grid,
            in_specs=[
                pl.BlockSpec((tb, F), lambda i: (i, 0)),   # x tile
                pl.BlockSpec((1, F), lambda i: (0, 0)),    # inv_mask (resident)
                pl.BlockSpec((1, F), lambda i: (0, 0)),    # pattern*mask (resident)
            ],
            out_specs=pl.BlockSpec((tb, F), lambda i: (i, 0)),
        ),
        compiler_params=pltpu.CompilerParams(
            dimension_semantics=("parallel",),
            vmem_limit_bytes=32 << 20,      # double-buffered 4 MiB tiles fit on v5e/v6e/v7x
        ),
    )(x2, inv_mask, pat_masked)

    return out2.reshape(B, C, H, W)


# ---------------------------------------------------------------------------
# Parameter construction (glue, plain JAX) — mirrors TriggerBadNet16.__init__
# ---------------------------------------------------------------------------
def make_trigger_params(image_size, xp=0, yp=0, sp=16, dtype=jnp.float32):
    mean = jnp.array([0.48145466, 0.4578275, 0.40821073], dtype=dtype)
    std = jnp.array([0.26862954, 0.26130258, 0.27577711], dtype=dtype)

    # pattern = (ones - mean) / std, per channel
    ones = jnp.ones((3, image_size, image_size), dtype=dtype)
    pattern = (ones - mean[:, None, None]) / std[:, None, None]

    # mask: 1 inside the [xp:xp+sp, yp:yp+sp] patch, 0 elsewhere
    mask = jnp.zeros((3, image_size, image_size), dtype=dtype)
    mask = mask.at[:, xp:xp + sp, yp:yp + sp].set(1.0)
    return pattern, mask


if __name__ == "__main__":
    # Module-consistent shapes: channels=3 (RGB), image_size=32
    # (image_size must be >= 16 so the 16x16 trigger patch fits).
    C, H = 3, 32
    key = jax.random.PRNGKey(0)
    pattern, mask = make_trigger_params(image_size=H, xp=0, yp=0, sp=16)

    ok = True
    # Small batch (single-block path) and a larger batch (multi-tile path).
    for B in (2, 64):
        kx, key = jax.random.split(key)
        x = jax.random.normal(kx, (B, C, H, H), dtype=jnp.float32)

        out = trigger_badnet16(x, pattern, mask)
        out = jax.block_until_ready(out)

        # Pure-JAX reference check
        ref = x * (1.0 - mask)[None] + (pattern * mask)[None]
        ok = ok and (out.shape == x.shape) and bool(jnp.allclose(out, ref, atol=1e-6))

    assert ok, "mismatch vs reference"
    print("KERNEL_OK")
</pallas_src>

<mosaic_0001>
module attributes {stable_mosaic.version = 11 : i64} {
  func.func @_trigger_blend_kernel(%arg0: i32, %arg1: memref<2x3072xf32, #tpu.memory_space<vmem>>, %arg2: memref<1x3072xf32, #tpu.memory_space<vmem>>, %arg3: memref<1x3072xf32, #tpu.memory_space<vmem>>, %arg4: memref<2x3072xf32, #tpu.memory_space<vmem>>) attributes {dimension_semantics = [#tpu.dimension_semantics<parallel>], iteration_bounds = array<i64: 1>, scalar_prefetch = 0 : i64, scratch_operands = 0 : i64, tpu.core_type = #tpu.core_type<tc>, window_params = [{transform_indices = @transform_0, window_bounds = array<i64: 2, 3072>}, {pipeline_mode = #tpu.pipeline_mode<synchronous>, transform_indices = @transform_1, window_bounds = array<i64: 1, 3072>}, {pipeline_mode = #tpu.pipeline_mode<synchronous>, transform_indices = @transform_2, window_bounds = array<i64: 1, 3072>}, {transform_indices = @transform_3, window_bounds = array<i64: 2, 3072>}]} {
    %c0 = arith.constant 0 : index
    %c0_0 = arith.constant 0 : index
    %0 = vector.load %arg1[%c0, %c0_0] : memref<2x3072xf32, #tpu.memory_space<vmem>>, vector<2x3072xf32>
    %c0_1 = arith.constant 0 : index
    %c0_2 = arith.constant 0 : index
    %1 = vector.load %arg2[%c0_1, %c0_2] : memref<1x3072xf32, #tpu.memory_space<vmem>>, vector<1x3072xf32>
    %2 = vector.broadcast %1 : vector<1x3072xf32> to vector<2x3072xf32>
    %3 = arith.mulf %0, %2 : vector<2x3072xf32>
    %c0_3 = arith.constant 0 : index
    %c0_4 = arith.constant 0 : index
    %4 = vector.load %arg3[%c0_3, %c0_4] : memref<1x3072xf32, #tpu.memory_space<vmem>>, vector<1x3072xf32>
    %5 = vector.broadcast %4 : vector<1x3072xf32> to vector<2x3072xf32>
    %6 = arith.addf %3, %5 : vector<2x3072xf32>
    %c0_5 = arith.constant 0 : index
    %c0_6 = arith.constant 0 : index
    %7 = vector.load %arg4[%c0_5, %c0_6] : memref<2x3072xf32, #tpu.memory_space<vmem>>, vector<2x3072xf32>
    tpu.vector_store %arg4[%c0_5, %c0_6], %6 {strides = array<i32>} : memref<2x3072xf32, #tpu.memory_space<vmem>>, vector<2x3072xf32>,
    return
  }
  func.func @transform_0(%arg0: i32) -> (i32, i32) {
    %c0_i32 = arith.constant 0 : i32
    %c0_i32_0 = arith.constant 0 : i32
    return %arg0, %c0_i32 : i32, i32
  }
  func.func @transform_1(%arg0: i32) -> (i32, i32) {
    %c0_i32 = arith.constant 0 : i32
    %c0_i32_0 = arith.constant 0 : i32
    %c0_i32_1 = arith.constant 0 : i32
    return %c0_i32, %c0_i32_0 : i32, i32
  }
  func.func @transform_2(%arg0: i32) -> (i32, i32) {
    %c0_i32 = arith.constant 0 : i32
    %c0_i32_0 = arith.constant 0 : i32
    %c0_i32_1 = arith.constant 0 : i32
    return %c0_i32, %c0_i32_0 : i32, i32
  }
  func.func @transform_3(%arg0: i32) -> (i32, i32) {
    %c0_i32 = arith.constant 0 : i32
    %c0_i32_0 = arith.constant 0 : i32
    return %arg0, %c0_i32 : i32, i32
  }
}

</mosaic_0001>

<bundles_post_ra>
// kernel: tpu_custom_call.1
= control target key start
LH: loop header
LB: loop body
LE: loop exit
PB: predicated region body
PF: predicated region fallthrough
CT: control target
= control target key end

     0   :  { %8 = vsyncpa [#allocation3], 0  ;;  %s772_s0 = inlined_call_operand.hbm [shape: f32[2,3072], index: 0, kind: input, shape index: {}]   ;;  %s773_s1 = inlined_call_operand.hbm [shape: f32[1,3072], index: 1, kind: input, shape index: {}]   ;;  %s774_s2 = inlined_call_operand.hbm [shape: f32[1,3072], index: 2, kind: input, shape index: {}]   ;;  %s775_s3 = inlined_call_operand.hbm [shape: f32[2,3072], index: 3, kind: output, shape index: {}]  }
   0x1   :  { %9 = vsyncpa [#allocation6], 0 }
   0x2   :  { %10 = vsyncpa [#allocation4], 0  ;;  %s609_s12 = smov [#allocation5]   ;;  %s610_s14 = smov [#allocation2]  }
   0x3   :  { %s27_s13 = sshll.u32 %s609_s12, 4  ;;  %s17_s15 = sshll.u32 %s610_s14, 4  ;;  %s28_s13 = int_to_ptr.vmem [resolvable:$true] %s27_s13  ;;  %s18_s15 = int_to_ptr.vmem [resolvable:$true] %s17_s15 }
   0x4   :  { %s515_s18 = scalar_lea.hbm %s773_s1, 384 }
   0x5   :  { %p516_p0 = scmp.ne.s32.totalorder %s773_s1, %s515_s18  ;;  %p519_p1 = scmp.lt.u32.totalorder %s515_s18, %s773_s1 }
   0x7   :  { %p521_p2 = pnand %p519_p1, %p516_p0 }
   0x9   :  { %524 = shalt.err (!%p521_p2)
}
   0xa   :  { %s525_s23 = scalar_lea.vmem %s28_s13, 384  ;;  %p530_p4 = scmp.lt.s32.totalorder %s28_s13, %s28_s13 }
   0xb   :  { %p526_p3 = scmp.ne.s32.totalorder %s28_s13, %s525_s23  ;;  %p531_p5 = scmp.lt.s32.totalorder %s525_s23, %s525_s23 }
   0xd   :  { %p532_p6 = por %p531_p5, %p530_p4 }
   0xf   :  { %p533_p7 = pnand %p532_p6, %p526_p3 }
  0x11   :  { %536 = shalt.err (!%p533_p7)
}
  0x12   :  { %30 = dma.hbm_to_vmem [thread:$0]  %s773_s1, 384, %s28_s13, [#allocation6]  }
  0x13   :  { %s537_s28 = scalar_lea.hbm %s772_s0, 768 }
  0x14   :  { %p538_p8 = scmp.ne.s32.totalorder %s772_s0, %s537_s28  ;;  %p541_p9 = scmp.lt.u32.totalorder %s537_s28, %s772_s0 }
  0x16   :  { %p543_p10 = pnand %p541_p9, %p538_p8 }
  0x18   :  { %546 = shalt.err (!%p543_p10)
}
  0x19   :  { %s547_s6 = scalar_lea.vmem %s18_s15, 768  ;;  %p552_p12 = scmp.lt.s32.totalorder %s18_s15, %s18_s15 }
  0x1a   :  { %p548_p11 = scmp.ne.s32.totalorder %s18_s15, %s547_s6  ;;  %p553_p13 = scmp.lt.s32.totalorder %s547_s6, %s547_s6 }
  0x1c   :  { %p554_p0 = por %p553_p13, %p552_p12 }
  0x1e   :  { %p555_p1 = pnand %p554_p0, %p548_p11 }
  0x20   :  { %558 = shalt.err (!%p555_p1)
}
  0x21   :  { %20 = dma.hbm_to_vmem [thread:$0]  %s772_s0, 768, %s18_s15, [#allocation3]  }
  0x22   :  { %s611_s8 = smov [#allocation7]   ;;  %s559_s12 = scalar_lea.hbm %s774_s2, 384 }
  0x23   :  { %s37_s9 = sshll.u32 %s611_s8, 4  ;;  %p560_p2 = scmp.ne.s32.totalorder %s774_s2, %s559_s12  ;;  %s38_s9 = int_to_ptr.vmem [resolvable:$true] %s37_s9 }
  0x24   :  { %p563_p3 = scmp.lt.u32.totalorder %s559_s12, %s774_s2 }
  0x26   :  { %p565_p4 = pnand %p563_p3, %p560_p2 }
  0x28   :  { %568 = shalt.err (!%p565_p4)
}
  0x29   :  { %s569_s18 = scalar_lea.vmem %s38_s9, 384  ;;  %p574_p6 = scmp.lt.s32.totalorder %s38_s9, %s38_s9 }
  0x2a   :  { %p570_p5 = scmp.ne.s32.totalorder %s38_s9, %s569_s18  ;;  %p575_p7 = scmp.lt.s32.totalorder %s569_s18, %s569_s18 }
  0x2c   :  { %p576_p8 = por %p575_p7, %p574_p6 }
  0x2e   :  { %p577_p9 = pnand %p576_p8, %p570_p5 }
  0x30   :  { %580 = shalt.err (!%p577_p9)
}
  0x31   :  { %40 = dma.hbm_to_vmem [thread:$0]  %s774_s2, 384, %s38_s9, [#allocation6]  }
  0x32   :  { %603 = dma.done.wait [#allocation3], 768  }
  0x33   :  { %604 = vsyncadd [#allocation3], 4294966528 }
  0x34   :  { %605 = dma.done.wait [#allocation6], 768  }
  0x35   :  { %606 = vsyncadd [#allocation6], 4294966528  ;;  %v62_v0 = vlaneseq  ;;  %v612_v1 = vmov 1983009808   ;;  %v56_v11 = vld [vmem:[#allocation5] sm:$0xff]  ;;  %v272_v13 = vld [vmem:[#allocation7] sm:$0xff] }
  0x36   :  { %v161_v2 = vunpack.c.l.s4 %v612_v1  ;;  %v57_v36 = vld [vmem:[#allocation5 + $0x8] sm:$0xff]  ;;  %v50_v37 = vld [vmem:[#allocation2] sm:$0xff]  ;;  %v273_v46 = vld [vmem:[#allocation7 + $0x8] sm:$0xff]  ;;  %s613_s2 = smov [#allocation8]  }
  0x37   :  { %v63_v3 = vshrl.u32 %v62_v0, 7  ;;  %v51_v52 = vld [vmem:[#allocation2 + $0x8] sm:$0xff]  ;;  %s500_s19 = sshll.u32 %s613_s2, 4  ;;  %s501_s19 = int_to_ptr.vmem [resolvable:$true] %s500_s19 }
  0x38   :  { %v162_v4 = vunpack.c.0.s8 %v161_v2  ;;  %s581_s20 = scalar_lea.vmem %s501_s19, 768  ;;  %p586_p11 = scmp.lt.s32.totalorder %s501_s19, %s501_s19 }
  0x39   :  { %v670_v5 = vsub.s32 0, %v63_v3  ;;  %v672_v6 = vsub.s32 1, %v63_v3  ;;  %v674_v7 = vsub.s32 2, %v63_v3  ;;  %v676_v8 = vsub.s32 3, %v63_v3  ;;  %p582_p10 = scmp.ne.s32.totalorder %s501_s19, %s581_s20  ;;  %p587_p12 = scmp.lt.s32.totalorder %s581_s20, %s581_s20 }
  0x3a   :  { %v678_v9 = vsub.s32 4, %v63_v3  ;;  %v680_v10 = vsub.s32 5, %v63_v3  ;;  %v682_v12 = vsub.s32 %v162_v4, %v63_v3  ;;  %v684_v14 = vsub.s32 6, %v63_v3 }
  0x3b   :  { %v686_v15 = vsub.s32 7, %v63_v3  ;;  %v65_v16 = vrot.slane %v56_v11, %v670_v5  ;;  %v69_v17 = vrot.slane %v56_v11, %v672_v6  ;;  %v73_v18 = vrot.slane %v56_v11, %v674_v7  ;;  %p588_p13 = por %p587_p12, %p586_p11 }
  0x3c   :  { %v77_v19 = vrot.slane %v56_v11, %v676_v8  ;;  %v281_v20 = vrot.slane %v272_v13, %v670_v5  ;;  %v285_v21 = vrot.slane %v272_v13, %v672_v6  ;;  %v289_v22 = vrot.slane %v272_v13, %v674_v7 }
  0x3d   :  { %v293_v23 = vrot.slane %v272_v13, %v676_v8  ;;  %v158_v24 = vcombine.low %v65_v16, %v69_v17  ;;  %v81_v26 = vrot.slane %v56_v11, %v678_v9  ;;  %v85_v27 = vrot.slane %v56_v11, %v680_v10  ;;  %p589_p0 = pnand %p588_p13, %p582_p10 }
  0x3e   :  { %v159_v25 = vcombine.low %v73_v18, %v77_v19  ;;  %v374_v28 = vcombine.low %v281_v20, %v285_v21  ;;  %v89_v30 = vrot.slane %v56_v11, %v684_v14  ;;  %v93_v31 = vrot.slane %v56_v11, %v686_v15  ;;  %v58_v21 = vld [vmem:[#allocation5 + $0x10] sm:$0xff] }
  0x3f   :  { %v375_v29 = vcombine.low %v289_v22, %v293_v23  ;;  %v166_v32 = vrot.slane %v158_v24, %v682_v12  ;;  %v175_v34 = vcombine.low %v81_v26, %v85_v27  ;;  %v297_v35 = vrot.slane %v272_v13, %v678_v9  ;;  %v52_v23 = vld [vmem:[#allocation2 + $0x10] sm:$0xff] }
  0x40   :  { %v173_v33 = vrot.slane %v159_v25, %v682_v12  ;;  %v382_v38 = vrot.slane %v374_v28, %v682_v12  ;;  %v176_v40 = vcombine.low %v89_v30, %v93_v31  ;;  %v301_v41 = vrot.slane %v272_v13, %v680_v10 }
  0x41   :  { %v389_v39 = vrot.slane %v375_v29, %v682_v12  ;;  %v183_v43 = vrot.slane %v175_v34, %v682_v12  ;;  %v305_v44 = vrot.slane %v272_v13, %v684_v14  ;;  %v309_v45 = vrot.slane %v272_v13, %v686_v15 }
  0x42   :  { %v174_v42 = vcombine.low %v166_v32, %v173_v33  ;;  %v190_v48 = vrot.slane %v176_v40, %v682_v12  ;;  %v391_v49 = vcombine.low %v297_v35, %v301_v41  ;;  %v97_v50 = vrot.slane %v57_v36, %v670_v5  ;;  %v274_v35 = vld [vmem:[#allocation7 + $0x10] sm:$0xff] }
  0x43   :  { %v390_v47 = vcombine.low %v382_v38, %v389_v39  ;;  %v392_v53 = vcombine.low %v305_v44, %v309_v45  ;;  %v101_v54 = vrot.slane %v57_v36, %v672_v6  ;;  %v105_v55 = vrot.slane %v57_v36, %v674_v7  ;;  %v53_v45 = vld [vmem:[#allocation2 + $0x18] sm:$0xff] }
  0x44   :  { %v266_v51 = vmul.f32 %v174_v42, %v50_v37  ;;  %v191_v56 = vcombine.low %v183_v43, %v190_v48  ;;  %v399_v57 = vrot.slane %v391_v49, %v682_v12  ;;  %v109_v58 = vrot.slane %v57_v36, %v676_v8 }
  0x45   :  { %v313_v59 = vrot.slane %v273_v46, %v670_v5  ;;  %v406_v61 = vrot.slane %v392_v53, %v682_v12  ;;  %v192_v62 = vcombine.low %v97_v50, %v101_v54  ;;  %v317_v63 = vrot.slane %v273_v46, %v672_v6 }
  0x46   :  { %v482_v60 = vadd.f32 %v390_v47, %v266_v51  ;;  %v267_v0 = vmul.f32 %v191_v56, %v51_v52  ;;  %v193_v1 = vcombine.low %v105_v55, %v109_v58  ;;  %v321_v2 = vrot.slane %v273_v46, %v674_v7 }
  0x47   :  { %v325_v3 = vrot.slane %v273_v46, %v676_v8  ;;  %v407_v4 = vcombine.low %v399_v57, %v406_v61  ;;  %v200_v11 = vrot.slane %v192_v62, %v682_v12  ;;  %v408_v13 = vcombine.low %v313_v59, %v317_v63 }
  0x48   :  { %488 = vst [vmem:[#allocation8] sm:$0xff] %v482_v60  ;;  %v113_v16 = vrot.slane %v57_v36, %v678_v9  ;;  %v207_v17 = vrot.slane %v193_v1, %v682_v12  ;;  %v117_v19 = vrot.slane %v57_v36, %v680_v10  ;;  %v121_v20 = vrot.slane %v57_v36, %v684_v14 }
  0x49   :  { %v409_v18 = vcombine.low %v321_v2, %v325_v3  ;;  %v483_v22 = vadd.f32 %v407_v4, %v267_v0  ;;  %v416_v24 = vrot.slane %v408_v13, %v682_v12  ;;  %v125_v25 = vrot.slane %v57_v36, %v686_v15  ;;  %v54_v0 = vld [vmem:[#allocation2 + $0x20] sm:$0xff] }
  0x4a   :  { %v329_v26 = vrot.slane %v273_v46, %v678_v9  ;;  %v208_v27 = vcombine.low %v200_v11, %v207_v17  ;;  %v209_v29 = vcombine.low %v113_v16, %v117_v19  ;;  %v333_v30 = vrot.slane %v273_v46, %v680_v10 }
  0x4b   :  { %v423_v28 = vrot.slane %v409_v18, %v682_v12  ;;  %489 = vst [vmem:[#allocation8 + $0x8] sm:$0xff] %v483_v22  ;;  %v210_v31 = vcombine.low %v121_v20, %v125_v25  ;;  %v337_v32 = vrot.slane %v273_v46, %v684_v14  ;;  %v341_v33 = vrot.slane %v273_v46, %v686_v15 }
  0x4c   :  { %v129_v34 = vrot.slane %v58_v21, %v670_v5  ;;  %v268_v37 = vmul.f32 %v208_v27, %v52_v23  ;;  %v217_v36 = vrot.slane %v209_v29, %v682_v12  ;;  %v425_v39 = vcombine.low %v329_v26, %v333_v30 }
  0x4d   :  { %v424_v38 = vcombine.low %v416_v24, %v423_v28  ;;  %v224_v40 = vrot.slane %v210_v31, %v682_v12  ;;  %v426_v41 = vcombine.low %v337_v32, %v341_v33  ;;  %v133_v42 = vrot.slane %v58_v21, %v672_v6  ;;  %v55_v24 = vld [vmem:[#allocation2 + $0x28] sm:$0xff] }
  0x4e   :  { %v137_v43 = vrot.slane %v58_v21, %v674_v7  ;;  %v433_v47 = vrot.slane %v425_v39, %v682_v12  ;;  %v141_v46 = vrot.slane %v58_v21, %v676_v8  ;;  %v345_v48 = vrot.slane %v274_v35, %v670_v5 }
  0x4f   :  { %v484_v44 = vadd.f32 %v424_v38, %v268_v37  ;;  %v225_v49 = vcombine.low %v217_v36, %v224_v40  ;;  %v440_v50 = vrot.slane %v426_v41, %v682_v12  ;;  %v226_v51 = vcombine.low %v129_v34, %v133_v42 }
  0x50   :  { %v349_v52 = vrot.slane %v274_v35, %v672_v6  ;;  %v227_v53 = vcombine.low %v137_v43, %v141_v46  ;;  %v353_v54 = vrot.slane %v274_v35, %v674_v7  ;;  %v357_v55 = vrot.slane %v274_v35, %v676_v8 }
  0x51   :  { %490 = vst [vmem:[#allocation8 + $0x10] sm:$0xff] %v484_v44  ;;  %v145_v56 = vrot.slane %v58_v21, %v678_v9  ;;  %v269_v57 = vmul.f32 %v225_v49, %v53_v45  ;;  %v441_v58 = vcombine.low %v433_v47, %v440_v50  ;;  %v234_v59 = vrot.slane %v226_v51, %v682_v12 }
  0x52   :  { %v442_v60 = vcombine.low %v345_v48, %v349_v52  ;;  %v241_v5 = vrot.slane %v227_v53, %v682_v12  ;;  %v443_v61 = vcombine.low %v353_v54, %v357_v55  ;;  %v149_v62 = vrot.slane %v58_v21, %v680_v10 }
  0x53   :  { %v153_v6 = vrot.slane %v58_v21, %v684_v14  ;;  %v485_v63 = vadd.f32 %v441_v58, %v269_v57  ;;  %v157_v8 = vrot.slane %v58_v21, %v686_v15  ;;  %v361_v1 = vrot.slane %v274_v35, %v678_v9 }
  0x54   :  { %v450_v7 = vrot.slane %v442_v60, %v682_v12  ;;  %v242_v2 = vcombine.low %v234_v59, %v241_v5  ;;  %v457_v3 = vrot.slane %v443_v61, %v682_v12  ;;  %v243_v4 = vcombine.low %v145_v56, %v149_v62 }
  0x55   :  { %v365_v11 = vrot.slane %v274_v35, %v680_v10  ;;  %491 = vst [vmem:[#allocation8 + $0x18] sm:$0xff] %v485_v63  ;;  %v244_v13 = vcombine.low %v153_v6, %v157_v8  ;;  %v369_v16 = vrot.slane %v274_v35, %v684_v14  ;;  %v373_v17 = vrot.slane %v274_v35, %v686_v15 }
  0x56   :  { %v270_v18 = vmul.f32 %v242_v2, %v54_v0  ;;  %v458_v19 = vcombine.low %v450_v7, %v457_v3  ;;  %v251_v20 = vrot.slane %v243_v4, %v682_v12 }
  0x57   :  { %v459_v22 = vcombine.low %v361_v1, %v365_v11  ;;  %v258_v21 = vrot.slane %v244_v13, %v682_v12  ;;  %v460_v9 = vcombine.low %v369_v16, %v373_v17 }
  0x58   :  { %v486_v23 = vadd.f32 %v458_v19, %v270_v18 }
  0x59   :  { %v467_v25 = vrot.slane %v459_v22, %v682_v12  ;;  %v259_v26 = vcombine.low %v251_v20, %v258_v21  ;;  %v474_v10 = vrot.slane %v460_v9, %v682_v12 }
  0x5a   :  { %492 = vst [vmem:[#allocation8 + $0x20] sm:$0xff] %v486_v23 }
  0x5b   :  { %v271_v14 = vmul.f32 %v259_v26, %v55_v24  ;;  %v475_v15 = vcombine.low %v467_v25, %v474_v10 }
  0x5d   :  { %v487_v27 = vadd.f32 %v475_v15, %v271_v14 }
  0x5f   :  { %493 = vst [vmem:[#allocation8 + $0x28] sm:$0xff] %v487_v27 }
  0x60   :  { %592 = shalt.err (!%p589_p0)
}
  0x61   :  { %s593_s23 = scalar_lea.hbm %s775_s3, 768 }
  0x62   :  { %p594_p1 = scmp.ne.s32.totalorder %s775_s3, %s593_s23  ;;  %p597_p2 = scmp.lt.u32.totalorder %s593_s23, %s775_s3 }
  0x64   :  { %p599_p3 = pnand %p597_p2, %p594_p1 }
  0x66   :  { %602 = shalt.err (!%p599_p3)
}
  0x67   :  { %503 = dma.vmem_to_hbm [thread:$0]  %s501_s19, 768, %s775_s3, [#allocation4]  }
  0x68   :  { %607 = dma.done.wait [#allocation4], 768  }
  0x69   :  { %608 = vsyncadd [#allocation4], 4294966528 }
  0x6a   :  { %507 = vsyncpa [#allocation3], 1 }
  0x6b   :  { %508 = vsyncpa [#allocation6], 1 }
  0x6c   :  { %509 = vsyncpa [#allocation4], 1 }

</bundles_post_ra>
